<compile_context>
chip_gen: v7x
topology: tpu7x:2x2x1
jax: 0.10.0
libtpu: 0.0.40
codegen_flags: <defaults>
</compile_context>

<pallas_src>
import functools

import jax
import jax.numpy as jnp
from jax.experimental import pallas as pl
from jax.experimental.pallas import tpu as pltpu


def featurenet_kernel(x_ref, w1_ref, w2_ref, w3_ref, o_ref, *, k):
    """x_ref: (R, 3) f32 rows (point-major, k consecutive rows per point);
       w1_ref: (3, D) f32; w2_ref/w3_ref: (D, D) bf16; o_ref: (R // k, D) f32."""
    x = x_ref[...]                                    # (R, 3) f32
    w1 = w1_ref[...]                                  # (3, D) f32

    # Layer 1 on the VPU: contraction depth is only 3, so three broadcast
    # multiply-adds beat a lane-sparse MXU matmul.
    h = (x[:, 0:1] * w1[0:1, :]
         + x[:, 1:2] * w1[1:2, :]
         + x[:, 2:3] * w1[2:3, :])                    # (R, D) f32
    h = jnp.maximum(h, 0.0)

    # Layers 2/3: bf16 operands on the MXU, f32 accumulation, f32 ReLU.
    h = jnp.dot(h.astype(jnp.bfloat16), w2_ref[...],
                preferred_element_type=jnp.float32)   # (R, D) f32
    h = jnp.maximum(h, 0.0)
    h = jnp.dot(h.astype(jnp.bfloat16), w3_ref[...],
                preferred_element_type=jnp.float32)   # (R, D) f32
    h = jnp.maximum(h, 0.0)

    # Max over the k neighbors of each point. With k == 8 the groups align with
    # the sublane boundary, so this is a cheap per-tile sublane reduce.
    r, d = h.shape
    o_ref[...] = jnp.max(h.reshape(r // k, k, d), axis=1)


def knn_group_relative(x, k):
    """x: (B, 3, N) -> relative grouped coords (B, N, k, 3), matching group(xyz, None, k)."""
    p = jnp.transpose(x, (0, 2, 1))                         # (B, N, 3)
    sq = jnp.sum(p * p, axis=-1)                            # (B, N)
    d2 = sq[:, :, None] + sq[:, None, :] - 2.0 * jnp.einsum('bnc,bmc->bnm', p, p)
    _, idx = jax.lax.top_k(-d2, k + 1)                      # (B, N, k+1), ascending distance
    idx = idx[:, :, 1:]                                     # drop self (nearest)
    gathered = jax.vmap(lambda pts, ids: pts[ids])(p, idx)  # (B, N, k, 3)
    return gathered - p[:, :, None, :]                      # relative coords


def featurenet_forward(x, weights, k=8, tile_points=512):
    """x: (B, 3, N) float32. Returns (B, D, N) like the PyTorch module."""
    B, C, N = x.shape
    assert C == 3
    rel = knn_group_relative(x, k)                          # (B, N, k, 3)

    P = B * N
    w1, w2, w3 = weights
    D = w1.shape[1]
    assert D % 128 == 0, "dim must be a multiple of 128 for lane-aligned tiles"

    # Tile sizing: multiples of 8 points, capped by the problem size; pad P if
    # needed so the grid covers it exactly. 512 points -> 4096-row matmul M dim
    # (multiple of 256), comfortably inside scoped VMEM on v5e/v6e/v7x.
    tile_points = max(8, min(tile_points, P))
    tile_points -= tile_points % 8
    num_tiles = -(-P // tile_points)
    P_pad = num_tiles * tile_points
    tile_rows = tile_points * k

    xin = rel.reshape(P * k, 3).astype(jnp.float32)         # point-major rows
    if P_pad != P:
        xin = jnp.pad(xin, ((0, (P_pad - P) * k), (0, 0)))

    w1f = w1.astype(jnp.float32)
    w2b = w2.astype(jnp.bfloat16)                           # MXU fast path (layers 2/3)
    w3b = w3.astype(jnp.bfloat16)

    flops = 2 * P * k * (3 * D + 2 * D * D)
    bytes_accessed = P * k * 3 * 4 + P * D * 4 + (3 * D * 4 + 2 * D * D * 2)
    cost = pl.CostEstimate(flops=flops, transcendentals=0,
                           bytes_accessed=bytes_accessed)

    out = pl.pallas_call(
        functools.partial(featurenet_kernel, k=k),
        out_shape=jax.ShapeDtypeStruct((P_pad, D), jnp.float32),
        grid=(num_tiles,),
        in_specs=[
            pl.BlockSpec((tile_rows, 3), lambda i: (i, 0)),
            pl.BlockSpec((3, D), lambda i: (0, 0)),   # constant maps: weights stay
            pl.BlockSpec((D, D), lambda i: (0, 0)),   # resident in VMEM across steps
            pl.BlockSpec((D, D), lambda i: (0, 0)),
        ],
        out_specs=pl.BlockSpec((tile_points, D), lambda i: (i, 0)),
        compiler_params=pltpu.CompilerParams(
            dimension_semantics=("parallel",)),
        cost_estimate=cost,
    )(xin, w1f, w2b, w3b)

    out = out[:P].reshape(B, N, D)
    # TODO(synk): downstream consumers could take (B, N, D) directly and skip
    # this extra HBM transpose; kept here to match the PyTorch (B, D, N) layout.
    return jnp.transpose(out, (0, 2, 1))


def xavier_uniform(key, shape):
    fan_in, fan_out = shape
    bound = (6.0 / (fan_in + fan_out)) ** 0.5
    return jax.random.uniform(key, shape, jnp.float32, -bound, bound)


def make_weights(key, dim=128, num_block=3):
    """Conv2d weights (out, in, 1, 1) stored transposed as (in, out) matrices."""
    keys = jax.random.split(key, num_block)
    ws = [xavier_uniform(keys[0], (3, dim))]
    for i in range(1, num_block):
        ws.append(xavier_uniform(keys[i], (dim, dim)))
    return ws


def featurenet_reference(x, weights, k=8):
    """Pure-JAX f32 reference (matches the PyTorch module) for correctness checking."""
    rel = knn_group_relative(x, k)                          # (B, N, k, 3)
    h = rel
    for w in weights:
        h = jnp.maximum(jnp.einsum('bnkc,cd->bnkd', h, w), 0.0)
    out = jnp.max(h, axis=2)                                # (B, N, D)
    return jnp.transpose(out, (0, 2, 1))                    # (B, D, N)


if __name__ == "__main__":
    key = jax.random.PRNGKey(0)
    k_pts, k_w = jax.random.split(key)

    B, N, K, DIM, NUM_BLOCK = 2, 16, 8, 128, 3
    x = jax.random.normal(k_pts, (B, 3, N), dtype=jnp.float32)
    weights = make_weights(k_w, dim=DIM, num_block=NUM_BLOCK)

    out = featurenet_forward(x, weights, k=K)
    out = jax.block_until_ready(out)

    ref = featurenet_reference(x, weights, k=K)
    assert out.shape == (B, DIM, N)
    # Layers 2/3 run in bf16 (f32 accumulation) on the MXU, so allow a slightly
    # looser tolerance than pure f32.
    assert jnp.allclose(out, ref, atol=2e-2, rtol=2e-2)

    print("KERNEL_OK")
</pallas_src>

<mosaic_0001>
module attributes {stable_mosaic.version = 11 : i64} {
  func.func @featurenet_kernel(%arg0: i32, %arg1: memref<256x3xf32, #tpu.memory_space<vmem>>, %arg2: memref<3x128xf32, #tpu.memory_space<vmem>>, %arg3: memref<128x128xbf16, #tpu.memory_space<vmem>>, %arg4: memref<128x128xbf16, #tpu.memory_space<vmem>>, %arg5: memref<32x128xf32, #tpu.memory_space<vmem>>) attributes {dimension_semantics = [#tpu.dimension_semantics<parallel>], iteration_bounds = array<i64: 1>, scalar_prefetch = 0 : i64, scratch_operands = 0 : i64, tpu.core_type = #tpu.core_type<tc>, window_params = [{transform_indices = @transform_0, window_bounds = array<i64: 256, 3>}, {pipeline_mode = #tpu.pipeline_mode<synchronous>, transform_indices = @transform_1, window_bounds = array<i64: 3, 128>}, {pipeline_mode = #tpu.pipeline_mode<synchronous>, transform_indices = @transform_2, window_bounds = array<i64: 128, 128>}, {pipeline_mode = #tpu.pipeline_mode<synchronous>, transform_indices = @transform_3, window_bounds = array<i64: 128, 128>}, {transform_indices = @transform_4, window_bounds = array<i64: 32, 128>}]} {
    %c0 = arith.constant 0 : index
    %c0_0 = arith.constant 0 : index
    %0 = vector.load %arg1[%c0, %c0_0] : memref<256x3xf32, #tpu.memory_space<vmem>>, vector<256x3xf32>
    %c0_1 = arith.constant 0 : index
    %c0_2 = arith.constant 0 : index
    %1 = vector.load %arg2[%c0_1, %c0_2] : memref<3x128xf32, #tpu.memory_space<vmem>>, vector<3x128xf32>
    %2 = vector.extract_strided_slice %0 {offsets = [0, 0], sizes = [256, 1], strides = [1, 1]} : vector<256x3xf32> to vector<256x1xf32>
    %3 = vector.extract_strided_slice %1 {offsets = [0, 0], sizes = [1, 128], strides = [1, 1]} : vector<3x128xf32> to vector<1x128xf32>
    %4 = vector.broadcast %2 : vector<256x1xf32> to vector<256x128xf32>
    %5 = vector.broadcast %3 : vector<1x128xf32> to vector<256x128xf32>
    %6 = arith.mulf %4, %5 : vector<256x128xf32>
    %7 = vector.extract_strided_slice %0 {offsets = [0, 1], sizes = [256, 1], strides = [1, 1]} : vector<256x3xf32> to vector<256x1xf32>
    %8 = vector.extract_strided_slice %1 {offsets = [1, 0], sizes = [1, 128], strides = [1, 1]} : vector<3x128xf32> to vector<1x128xf32>
    %9 = vector.broadcast %7 : vector<256x1xf32> to vector<256x128xf32>
    %10 = vector.broadcast %8 : vector<1x128xf32> to vector<256x128xf32>
    %11 = arith.mulf %9, %10 : vector<256x128xf32>
    %12 = arith.addf %6, %11 : vector<256x128xf32>
    %13 = vector.extract_strided_slice %0 {offsets = [0, 2], sizes = [256, 1], strides = [1, 1]} : vector<256x3xf32> to vector<256x1xf32>
    %14 = vector.extract_strided_slice %1 {offsets = [2, 0], sizes = [1, 128], strides = [1, 1]} : vector<3x128xf32> to vector<1x128xf32>
    %15 = vector.broadcast %13 : vector<256x1xf32> to vector<256x128xf32>
    %16 = vector.broadcast %14 : vector<1x128xf32> to vector<256x128xf32>
    %17 = arith.mulf %15, %16 : vector<256x128xf32>
    %18 = arith.addf %12, %17 : vector<256x128xf32>
    %cst = arith.constant 0.000000e+00 : f32
    %19 = vector.broadcast %cst : f32 to vector<256x128xf32>
    %20 = arith.maximumf %18, %19 : vector<256x128xf32>
    %21 = arith.truncf %20 : vector<256x128xf32> to vector<256x128xbf16>
    %c0_3 = arith.constant 0 : index
    %c0_4 = arith.constant 0 : index
    %22 = vector.load %arg3[%c0_3, %c0_4] : memref<128x128xbf16, #tpu.memory_space<vmem>>, vector<128x128xbf16>
    %cst_5 = arith.constant dense<0.000000e+00> : vector<256x128xf32>
    %23 = tpu.matmul %21, %22, %cst_5 {dimension_numbers = #tpu.dot_dimension_numbers<[1], [0], [0], [1], [0, 0, 1, 1], [], []>} : vector<256x128xbf16>, vector<128x128xbf16>, vector<256x128xf32> -> vector<256x128xf32>
    %cst_6 = arith.constant 0.000000e+00 : f32
    %24 = vector.broadcast %cst_6 : f32 to vector<256x128xf32>
    %25 = arith.maximumf %23, %24 : vector<256x128xf32>
    %26 = arith.truncf %25 : vector<256x128xf32> to vector<256x128xbf16>
    %c0_7 = arith.constant 0 : index
    %c0_8 = arith.constant 0 : index
    %27 = vector.load %arg4[%c0_7, %c0_8] : memref<128x128xbf16, #tpu.memory_space<vmem>>, vector<128x128xbf16>
    %cst_9 = arith.constant dense<0.000000e+00> : vector<256x128xf32>
    %28 = tpu.matmul %26, %27, %cst_9 {dimension_numbers = #tpu.dot_dimension_numbers<[1], [0], [0], [1], [0, 0, 1, 1], [], []>} : vector<256x128xbf16>, vector<128x128xbf16>, vector<256x128xf32> -> vector<256x128xf32>
    %cst_10 = arith.constant 0.000000e+00 : f32
    %29 = vector.broadcast %cst_10 : f32 to vector<256x128xf32>
    %30 = arith.maximumf %28, %29 : vector<256x128xf32>
    %31 = vector.shape_cast %30 : vector<256x128xf32> to vector<32x8x128xf32>
    %cst_11 = arith.constant dense<0xFF800000> : vector<32x128xf32>
    %32 = vector.multi_reduction <maximumf>, %31, %cst_11 [1] : vector<32x8x128xf32> to vector<32x128xf32>
    %c0_12 = arith.constant 0 : index
    %c0_13 = arith.constant 0 : index
    %33 = vector.load %arg5[%c0_12, %c0_13] : memref<32x128xf32, #tpu.memory_space<vmem>>, vector<32x128xf32>
    tpu.vector_store %arg5[%c0_12, %c0_13], %32 {strides = array<i32>} : memref<32x128xf32, #tpu.memory_space<vmem>>, vector<32x128xf32>,
    return
  }
  func.func @transform_0(%arg0: i32) -> (i32, i32) {
    %c0_i32 = arith.constant 0 : i32
    %c0_i32_0 = arith.constant 0 : i32
    return %arg0, %c0_i32 : i32, i32
  }
  func.func @transform_1(%arg0: i32) -> (i32, i32) {
    %c0_i32 = arith.constant 0 : i32
    %c0_i32_0 = arith.constant 0 : i32
    %c0_i32_1 = arith.constant 0 : i32
    return %c0_i32, %c0_i32_0 : i32, i32
  }
  func.func @transform_2(%arg0: i32) -> (i32, i32) {
    %c0_i32 = arith.constant 0 : i32
    %c0_i32_0 = arith.constant 0 : i32
    %c0_i32_1 = arith.constant 0 : i32
    return %c0_i32, %c0_i32_0 : i32, i32
  }
  func.func @transform_3(%arg0: i32) -> (i32, i32) {
    %c0_i32 = arith.constant 0 : i32
    %c0_i32_0 = arith.constant 0 : i32
    %c0_i32_1 = arith.constant 0 : i32
    return %c0_i32, %c0_i32_0 : i32, i32
  }
  func.func @transform_4(%arg0: i32) -> (i32, i32) {
    %c0_i32 = arith.constant 0 : i32
    %c0_i32_0 = arith.constant 0 : i32
    return %arg0, %c0_i32 : i32, i32
  }
}

</mosaic_0001>

<bundles_post_ra>
// kernel: tpu_custom_call.1
= control target key start
LH: loop header
LB: loop body
LE: loop exit
PB: predicated region body
PF: predicated region fallthrough
CT: control target
= control target key end

     0   :  { %v1751_v2 = vmov 1   ;;  %v1752_v7 = vmov 0   ;;  %v1753_v8 = vmov 2   ;;  %s2278_s0 = inlined_call_operand.vmem [shape: f32[256,3], index: 0, kind: input, shape index: {}]   ;;  %s2279_s1 = inlined_call_operand.vmem [shape: f32[3,128], index: 1, kind: input, shape index: {}]   ;;  %s2280_s2 = inlined_call_operand.vmem [shape: bf16[128,128], index: 2, kind: input, shape index: {}]   ;;  %s2281_s3 = inlined_call_operand.vmem [shape: bf16[128,128], index: 3, kind: input, shape index: {}]   ;;  %s2282_s4 = inlined_call_operand.hbm [shape: f32[32,128], index: 4, kind: output, shape index: {}]  }
   0x1   :  { %v1785_v0 = vld [vmem:[%s2278_s0 + $0x10] sm:$0xff]  ;;  %v1790_v1 = vld [vmem:[%s2278_s0] sm:$0xff]  ;;  %1669 = vset.pattern.permute.xlu0 %v1751_v2  ;;  %1667 = vset.pattern.permute.xlu1 %v1751_v2  ;;  %v24_v3 = vld [vmem:[%s2278_s0 + $0x28] sm:$0xff] }
   0x2   :  { %257 = vperm.xlu0 %1669, %v1785_v0   ;;  %249 = vperm.xlu1 %1667, %v1790_v1   ;;  %v1802_v4 = vld [vmem:[%s2278_s0 + $0x8] sm:$0xff]  ;;  %v1808_v5 = vld [vmem:[%s2278_s0 + $0x30] sm:$0xff]  ;;  %v22_v6 = vld [vmem:[%s2278_s0 + $0x18] sm:$0xff] }
   0x3   :  { %v1819_v9 = vld [vmem:[%s2278_s0 + $0x20] sm:$0xff] }
   0x6   :  { %269 = vperm.xlu0 %1669, %v24_v3   ;;  %253 = vperm.xlu1 %1667, %v1802_v4  }
   0xa   :  { %273 = vperm.xlu0 %1669, %v1808_v5   ;;  %1668 = vset.pattern.permute.xlu1 %v1752_v7 }
   0xb   :  { %69 = vperm.xlu1 %1668, %v22_v6  }
   0xe   :  { %1675 = vset.pattern.permute.xlu0 %v1753_v8 }
   0xf   :  { %449 = vperm.xlu0 %1675, %v1802_v4   ;;  %1670 = vset.pattern.permute.xlu1 %v1751_v2 }
  0x10   :  { %261 = vperm.xlu1 %1670, %v22_v6  }
  0x13   :  { %461 = vperm.xlu0 %1675, %v1819_v9  }
  0x14   :  { %9 = vsyncpa [#allocation3], 0  ;;  %1671 = vset.pattern.permute.xlu1 %v1753_v8  ;;  %v26_v10 = vld [vmem:[%s2278_s0 + $0x38] sm:$0xff]  ;;  %v1832_v11 = vld [vmem:[%s2278_s0 + $0x48] sm:$0xff]  ;;  %v212_v60 = vlaneseq  ;;  %vm1442_vm0 = vcmask 1041409   ;;  %vm1444_vm1 = vcmask 1042434  }
  0x15   :  { %445 = vperm.xlu1 %1671, %v1790_v1   ;;  %v1839_v12 = vld [vmem:[%s2278_s0 + $0x60] sm:$0xff]  ;;  %v1845_v13 = vld [vmem:[%s2278_s0 + $0x78] sm:$0xff]  ;;  %v1852_v14 = vld [vmem:[%s2278_s0 + $0x88] sm:$0xff]  ;;  %vm1446_vm2 = vcmask 1043459   ;;  %vm1448_vm3 = vcmask 1044484   ;;  %vm1450_vm4 = vcmask 1045509  }
  0x16   :  { %v1860_v15 = vld [vmem:[%s2278_s0 + $0xa0] sm:$0xff]  ;;  %v1871_v17 = vld [vmem:[%s2278_s0 + $0xb8] sm:$0xff]  ;;  %v1712_v18 = vld [vmem:[%s2280_s2 + $0x8] sm:$0xff]   ;;  %v213_v63 = vshrl.u32 %v212_v60, 7  ;;  %vm1452_vm5 = vcmask 1046534   ;;  %vm1454_vm6 = vcmask 1047559  }
  0x17   :  { %473 = vperm.xlu0 %1675, %v26_v10   ;;  %v1711_v16 = vld [vmem:[%s2280_s2] sm:$0xff]   ;;  %v1880_v19 = vld [vmem:[%s2278_s0 + $0xc8] sm:$0xff]  ;;  %v1713_v20 = vld [vmem:[%s2280_s2 + $0x10] sm:$0xff]  }
  0x18   :  { %1565 = vmatprep.subr.bf16.mxu0 %v1711_v16  ;;  %v1714_v21 = vld [vmem:[%s2280_s2 + $0x18] sm:$0xff]   ;;  %v1715_v22 = vld [vmem:[%s2280_s2 + $0x20] sm:$0xff]   ;;  %v1716_v23 = vld [vmem:[%s2280_s2 + $0x28] sm:$0xff]  }
  0x19   :  { %453 = vperm.xlu1 %1671, %v1785_v0   ;;  %1566 = vmatpush3.bf16.msra.mxu0 %v1711_v16  ;;  %v27_v24 = vld [vmem:[%s2278_s0 + $0x40] sm:$0xff]  ;;  %v1717_v25 = vld [vmem:[%s2280_s2 + $0x30] sm:$0xff]   ;;  %v1718_v26 = vld [vmem:[%s2280_s2 + $0x38] sm:$0xff]  }
  0x1a   :  { %1567 = vmatprep.subr.bf16.mxu0 %v1712_v18  ;;  %v29_v27 = vld [vmem:[%s2278_s0 + $0x50] sm:$0xff]  ;;  %v30_v28 = vld [vmem:[%s2278_s0 + $0x58] sm:$0xff]  ;;  %v1944_v31 = vld [vmem:[%s2278_s0 + $0xe0] sm:$0xff] }
  0x1b   :  { %481 = vperm.xlu0 %1675, %v1832_v11   ;;  %v1929_v29 = vld [vmem:[%s2278_s0 + $0x90] sm:$0xff]  ;;  %v32_v32 = vld [vmem:[%s2278_s0 + $0x68] sm:$0xff]  ;;  %v35_v40 = vld [vmem:[%s2278_s0 + $0x80] sm:$0xff] }
  0x1c   :  { %v1938_v30 = vld [vmem:[%s2278_s0 + $0xd0] sm:$0xff]  ;;  %v1964_v34 = vld [vmem:[%s2278_s0 + $0xa8] sm:$0xff]  ;;  %v38_v49 = vld [vmem:[%s2278_s0 + $0x98] sm:$0xff] }
  0x1d   :  { %457 = vperm.xlu1 %1671, %v22_v6   ;;  %1568 = vmatpush3.bf16.msra.mxu0 %v1712_v18  ;;  %v33_v33 = vld [vmem:[%s2278_s0 + $0x70] sm:$0xff]  ;;  %v1990_v41 = vld [vmem:[%s2278_s0 + $0xe8] sm:$0xff]  ;;  %v2016_v50 = vld [vmem:[%s2278_s0 + $0xf8] sm:$0xff] }
  0x1e   :  { %1569 = vmatprep.subr.bf16.mxu0 %v1713_v20  ;;  %v1971_v35 = vld [vmem:[%s2278_s0 + $0xb0] sm:$0xff] }
  0x1f   :  { %493 = vperm.xlu0 %1675, %v1839_v12   ;;  %v2001_v44 = vld [vmem:[%s2278_s0 + $0xf0] sm:$0xff] }
  0x21   :  { %1672 = vset.pattern.permute.xlu1 %v1752_v7  ;;  %1570 = vmatpush3.bf16.msra.mxu0 %v1713_v20 }
  0x22   :  { %79 = vperm.xlu1 %1672, %v24_v3   ;;  %1571 = vmatprep.subr.bf16.mxu0 %v1714_v21 }
  0x23   :  { %505 = vperm.xlu0 %1675, %v1845_v13  }
  0x25   :  { %1572 = vmatpush3.bf16.msra.mxu0 %v1714_v21 }
  0x26   :  { %1673 = vset.pattern.permute.xlu1 %v1751_v2  ;;  %1573 = vmatprep.subr.bf16.mxu0 %v1715_v22 }
  0x27   :  { %513 = vperm.xlu0 %1675, %v1852_v14   ;;  %265 = vperm.xlu1 %1673, %v1819_v9  }
  0x29   :  { %1574 = vmatpush3.bf16.msra.mxu0 %v1715_v22 }
  0x2a   :  { %1575 = vmatprep.subr.bf16.mxu0 %v1716_v23 }
  0x2b   :  { %525 = vperm.xlu0 %1675, %v1860_v15   ;;  %1674 = vset.pattern.permute.xlu1 %v1752_v7 }
  0x2c   :  { %84 = vperm.xlu1 %1674, %v1808_v5  }
  0x2d   :  { %1576 = vmatpush3.bf16.msra.mxu0 %v1716_v23 }
  0x2e   :  { %1577 = vmatprep.subr.bf16.mxu0 %v1717_v25 }
  0x2f   :  { %537 = vperm.xlu0 %1675, %v1871_v17  }
  0x30   :  { %89 = vperm.xlu1 %1674, %v26_v10  }
  0x31   :  { %1578 = vmatpush3.bf16.msra.mxu0 %v1717_v25 }
  0x32   :  { %1579 = vmatprep.subr.bf16.mxu0 %v1718_v26 }
  0x33   :  { %545 = vperm.xlu0 %1675, %v1880_v19  }
  0x34   :  { %1676 = vset.pattern.permute.xlu1 %v1751_v2 }
  0x35   :  { %277 = vperm.xlu1 %1676, %v26_v10   ;;  %1580 = vmatpush3.bf16.msra.mxu0 %v1718_v26  ;;  %v574_v10 = vsub.s32 2, %v213_v63 }
  0x37   :  { %1703 = vset.pattern.permute.xlu0 %v1752_v7 }
  0x38   :  { %54 = vperm.xlu0 %1703, %v1790_v1  }
  0x39   :  { %1677 = vset.pattern.permute.xlu1 %v1753_v8 }
  0x3a   :  { %465 = vperm.xlu1 %1677, %v24_v3   ;;  %v378_v3 = vsub.s32 1, %v213_v63 }
  0x3c   :  { %59 = vperm.xlu0 %1703, %v1802_v4   ;;  %v51_v4 = vld [vmem:[%s2279_s1] sm:$0x7] }
  0x3d   :  { %v2053_v16 = vrot.slane %v51_v4, %v574_v10 }
  0x3e   :  { %469 = vperm.xlu1 %1677, %v1808_v5   ;;  %v214_v5 = vsub.s32 0, %v213_v63 }
  0x40   :  { %64 = vperm.xlu0 %1703, %v1785_v0  }
  0x42   :  { %1678 = vset.pattern.permute.xlu1 %v1752_v7 }
  0x43   :  { %94 = vperm.xlu1 %1678, %v27_v24  }
  0x44   :  { %74 = vperm.xlu0 %1703, %v1819_v9   ;;  %v2046_v9 = vrot.slane %v51_v4, %v378_v3 }
  0x47   :  { %1679 = vset.pattern.permute.xlu1 %v1751_v2 }
  0x48   :  { %99 = vperm.xlu0 %1703, %v1832_v11   ;;  %281 = vperm.xlu1 %1679, %v27_v24  }
  0x4c   :  { %104 = vperm.xlu0 %1703, %v29_v27   ;;  %285 = vperm.xlu1 %1679, %v1832_v11  }
  0x50   :  { %114 = vperm.xlu0 %1703, %v1839_v12   ;;  %1680 = vset.pattern.permute.xlu1 %v1752_v7 }
  0x51   :  { %109 = vperm.xlu1 %1680, %v30_v28  }
  0x54   :  { %139 = vperm.xlu0 %1703, %v1852_v14  }
  0x55   :  { %1681 = vset.pattern.permute.xlu1 %v1751_v2 }
  0x56   :  { %293 = vperm.xlu1 %1681, %v30_v28  }
  0x58   :  { %144 = vperm.xlu0 %1703, %v1929_v29  }
  0x5a   :  { %1682 = vset.pattern.permute.xlu1 %v1753_v8 }
  0x5b   :  { %477 = vperm.xlu1 %1682, %v27_v24  }
  0x5c   :  { %154 = vperm.xlu0 %1703, %v1860_v15  }
  0x5f   :  { %485 = vperm.xlu1 %1682, %v29_v27  }
  0x60   :  { %179 = vperm.xlu0 %1703, %v1880_v19  }
  0x63   :  { %489 = vperm.xlu1 %1682, %v30_v28  }
  0x64   :  { %184 = vperm.xlu0 %1703, %v1938_v30  }
  0x67   :  { %1683 = vset.pattern.permute.xlu1 %v1752_v7 }
  0x68   :  { %194 = vperm.xlu0 %1703, %v1944_v31   ;;  %119 = vperm.xlu1 %1683, %v32_v32  }
  0x6c   :  { %1704 = vset.pattern.permute.xlu0 %v1751_v2  ;;  %1684 = vset.pattern.permute.xlu1 %v1751_v2 }
  0x6d   :  { %289 = vperm.xlu0 %1704, %v29_v27   ;;  %297 = vperm.xlu1 %1684, %v1839_v12   ;;  %v2048_v12 = vrot.slane %v51_v4, %v214_v5 }
  0x71   :  { %301 = vperm.xlu0 %1704, %v32_v32   ;;  %1685 = vset.pattern.permute.xlu1 %v1752_v7 }
  0x72   :  { %124 = vperm.xlu1 %1685, %v33_v33  }
  0x75   :  { %305 = vperm.xlu0 %1704, %v33_v33  }
  0x76   :  { %129 = vperm.xlu1 %1685, %v1845_v13  }
  0x79   :  { %321 = vperm.xlu0 %1704, %v1929_v29  }
  0x7a   :  { %1686 = vset.pattern.permute.xlu1 %v1751_v2 }
  0x7b   :  { %309 = vperm.xlu1 %1686, %v1845_v13  }
  0x7d   :  { %333 = vperm.xlu0 %1704, %v1964_v34  }
  0x7f   :  { %1687 = vset.pattern.permute.xlu1 %v1753_v8 }
  0x80   :  { %497 = vperm.xlu1 %1687, %v32_v32  }
  0x81   :  { %v1974_v36 = vpop.permute.xlu1 %249  ;;  %v1976_v37 = vpop.permute.xlu0 %257  ;;  %337 = vperm.xlu0 %1704, %v1971_v35  }
  0x82   :  { %v382_v32 = vmul.f32 %v2046_v9, %v1976_v37 }
  0x84   :  { %501 = vperm.xlu1 %1687, %v33_v33  }
  0x85   :  { %v1979_v38 = vpop.permute.xlu1 %253  ;;  %v1981_v39 = vpop.permute.xlu0 %269  ;;  %353 = vperm.xlu0 %1704, %v1938_v30  }
  0x86   :  { %v381_v23 = vmul.f32 %v2046_v9, %v1979_v38  ;;  %v385_v38 = vmul.f32 %v2046_v9, %v1981_v39 }
  0x88   :  { %1688 = vset.pattern.permute.xlu1 %v1752_v7 }
  0x89   :  { %134 = vperm.xlu1 %1688, %v35_v40   ;;  %v1993_v42 = vpop.permute.xlu0 %273  ;;  %365 = vperm.xlu0 %1704, %v1990_v41  }
  0x8a   :  { %v1996_v43 = vpop.permute.xlu1 %69 }
  0x8b   :  { %v219_v27 = vmul.f32 %v2048_v12, %v1996_v43 }
  0x8d   :  { %1689 = vset.pattern.permute.xlu1 %v1751_v2  ;;  %369 = vperm.xlu0 %1704, %v2001_v44  }
  0x8e   :  { %313 = vperm.xlu1 %1689, %v35_v40   ;;  %v450_v45 = vpop.permute.xlu0 %449 }
  0x8f   :  { %v262_v46 = vpop.permute.xlu1 %261  ;;  %v577_v24 = vmul.f32 %v2053_v16, %v450_v45 }
  0x90   :  { %v383_v21 = vmul.f32 %v2046_v9, %v262_v46 }
  0x91   :  { %1709 = vset.pattern.permute.xlu0 %v1753_v8 }
  0x92   :  { %317 = vperm.xlu1 %1689, %v1852_v14   ;;  %v2007_v47 = vpop.permute.xlu0 %461  ;;  %557 = vperm.xlu0 %1709, %v1944_v31   ;;  %v380_v14 = vmul.f32 %v2046_v9, %v1974_v36 }
  0x93   :  { %v580_v5 = vmul.f32 %v2053_v16, %v2007_v47 }
  0x94   :  { %v446_v48 = vpop.permute.xlu1 %445 }
  0x95   :  { %v576_v25 = vmul.f32 %v2053_v16, %v446_v48  ;;  %v386_v48 = vmul.f32 %v2046_v9, %v1993_v42 }
  0x96   :  { %1690 = vset.pattern.permute.xlu1 %v1752_v7  ;;  %v2019_v51 = vpop.permute.xlu0 %473  ;;  %569 = vperm.xlu0 %1709, %v2016_v50  }
  0x97   :  { %149 = vperm.xlu1 %1690, %v38_v49  }
  0x98   :  { %v454_v52 = vpop.permute.xlu1 %453 }
  0x9a   :  { %v2022_v53 = vpop.permute.xlu0 %481 }
  0x9b   :  { %1691 = vset.pattern.permute.xlu1 %v1751_v2 }
  0x9c   :  { %325 = vperm.xlu1 %1691, %v38_v49   ;;  %v458_v54 = vpop.permute.xlu1 %457 }
  0x9d   :  { %v579_v28 = vmul.f32 %v2053_v16, %v458_v54  ;;  %v578_v54 = vmul.f32 %v2053_v16, %v454_v52 }
  0x9e   :  { %v2025_v55 = vpop.permute.xlu0 %493 }
  0xa0   :  { %1692 = vset.pattern.permute.xlu1 %v1753_v8 }
  0xa1   :  { %509 = vperm.xlu1 %1692, %v35_v40   ;;  %v80_v56 = vpop.permute.xlu1 %79  ;;  %v415_v40 = vadd.f32 %v383_v21, %v219_v27 }
  0xa2   :  { %v2028_v57 = vpop.permute.xlu0 %505  ;;  %v221_v45 = vmul.f32 %v2048_v12, %v80_v56 }
  0xa3   :  { %v611_v37 = vadd.f32 %v579_v28, %v415_v40 }
  0xa4   :  { %v417_v10 = vadd.f32 %v385_v38, %v221_v45 }
  0xa5   :  { %517 = vperm.xlu1 %1692, %v1929_v29  }
  0xa6   :  { %v266_v58 = vpop.permute.xlu1 %265  ;;  %v2031_v59 = vpop.permute.xlu0 %513 }
  0xa9   :  { %521 = vperm.xlu1 %1692, %v38_v49  }
  0xaa   :  { %v2033_v61 = vpop.permute.xlu0 %525 }
  0xab   :  { %v85_v62 = vpop.permute.xlu1 %84 }
  0xac   :  { %v222_v60 = vmul.f32 %v2048_v12, %v85_v62 }
  0xad   :  { %1693 = vset.pattern.permute.xlu1 %v1752_v7 }
  0xae   :  { %159 = vperm.xlu1 %1693, %v1964_v34   ;;  %v2037_v0 = vpop.permute.xlu0 %537  ;;  %v418_v21 = vadd.f32 %v386_v48, %v222_v60 }
  0xaf   :  { %v90_v1 = vpop.permute.xlu1 %89 }
  0xb0   :  { %v223_v52 = vmul.f32 %v2048_v12, %v90_v1 }
  0xb2   :  { %1694 = vset.pattern.permute.xlu1 %v1751_v2  ;;  %v2043_v6 = vpop.permute.xlu0 %545 }
  0xb3   :  { %329 = vperm.xlu1 %1694, %v1860_v15  }
  0xb4   :  { %v278_v11 = vpop.permute.xlu1 %277 }
  0xb5   :  { %v387_v63 = vmul.f32 %v2046_v9, %v278_v11 }
  0xb7   :  { %v55_v13 = vpop.permute.xlu0 %54  ;;  %1695 = vset.pattern.permute.xlu1 %v1752_v7  ;;  %v419_v47 = vadd.f32 %v387_v63, %v223_v52 }
  0xb8   :  { %v216_v18 = vmul.f32 %v2048_v12, %v55_v13  ;;  %164 = vperm.xlu1 %1695, %v1971_v35   ;;  %v384_v13 = vmul.f32 %v2046_v9, %v266_v58 }
  0xb9   :  { %v466_v20 = vpop.permute.xlu1 %465 }
  0xba   :  { %v412_v15 = vadd.f32 %v380_v14, %v216_v18  ;;  %v581_v39 = vmul.f32 %v2053_v16, %v466_v20  ;;  %v583_v20 = vmul.f32 %v2053_v16, %v2019_v51 }
  0xbb   :  { %v60_v22 = vpop.permute.xlu0 %59 }
  0xbc   :  { %v217_v26 = vmul.f32 %v2048_v12, %v60_v22  ;;  %169 = vperm.xlu1 %1695, %v1871_v17   ;;  %v608_v36 = vadd.f32 %v576_v25, %v412_v15  ;;  %v643_v15 = vmax.f32 %v611_v37, 0.0  ;;  %v613_v22 = vadd.f32 %v581_v39, %v417_v10 }
  0xbd   :  { %v470_v29 = vpop.permute.xlu1 %469  ;;  %v615_v28 = vadd.f32 %v583_v20, %v419_v47  ;;  %v585_v37 = vmul.f32 %v2053_v16, %v2022_v53 }
  0xbe   :  { %v413_v33 = vadd.f32 %v381_v23, %v217_v26  ;;  %v640_v4 = vmax.f32 %v608_v36, 0.0  ;;  %v582_v62 = vmul.f32 %v2053_v16, %v470_v29  ;;  %v645_v29 = vmax.f32 %v613_v22, 0.0 }
  0xbf   :  { %v65_v46 = vpop.permute.xlu0 %64  ;;  %v647_v40 = vmax.f32 %v615_v28, 0.0 }
  0xc0   :  { %v218_v43 = vmul.f32 %v2048_v12, %v65_v46  ;;  %1696 = vset.pattern.permute.xlu1 %v1751_v2  ;;  %v609_v49 = vadd.f32 %v577_v24, %v413_v33  ;;  %v614_v25 = vadd.f32 %v582_v62, %v418_v21 }
  0xc1   :  { %341 = vperm.xlu1 %1696, %v1871_v17  }
  0xc2   :  { %v414_v56 = vadd.f32 %v382_v32, %v218_v43  ;;  %v95_v3 = vpop.permute.xlu1 %94  ;;  %v641_v42 = vmax.f32 %v609_v49, 0.0  ;;  %v646_v36 = vmax.f32 %v614_v25, 0.0 }
  0xc3   :  { %v75_v14 = vpop.permute.xlu0 %74 }
  0xc4   :  { %v610_v11 = vadd.f32 %v578_v54, %v414_v56  ;;  %v220_v17 = vmul.f32 %v2048_v12, %v75_v14  ;;  %v672_v18 = vpack.c.bf16 %v641_v42, %v640_v4  ;;  %v675_v48 = vpack.c.bf16 %v647_v40, %v646_v36  ;;  %v46_v42 = vld [vmem:[%s2278_s0 + $0xd8] sm:$0xff] }
  0xc5   :  { %1697 = vset.pattern.permute.xlu1 %v1753_v8  ;;  %v224_v56 = vmul.f32 %v2048_v12, %v95_v3 }
  0xc6   :  { %v642_v23 = vmax.f32 %v610_v11, 0.0  ;;  %v416_v58 = vadd.f32 %v384_v13, %v220_v17  ;;  %529 = vperm.xlu1 %1697, %v1964_v34   ;;  %1581 = vmatprep.mubr.bf16.mxu0 %v672_v18  ;;  %v43_v34 = vld [vmem:[%s2278_s0 + $0xc0] sm:$0xff] }
  0xc7   :  { %v282_v1 = vpop.permute.xlu1 %281  ;;  %v100_v24 = vpop.permute.xlu0 %99 }
  0xc8   :  { %v612_v26 = vadd.f32 %v580_v5, %v416_v58  ;;  %v673_v27 = vpack.c.bf16 %v643_v15, %v642_v23  ;;  %v388_v60 = vmul.f32 %v2046_v9, %v282_v1 }
  0xca   :  { %v644_v32 = vmax.f32 %v612_v26, 0.0  ;;  %533 = vperm.xlu1 %1697, %v1971_v35   ;;  %1582 = vmatmul.mubr.bf16.vlgmr.msra.gmra.mrb[0].mxu0 %v673_v27  ;;  %v225_v35 = vmul.f32 %v2048_v12, %v100_v24  ;;  %v420_v5 = vadd.f32 %v388_v60, %v224_v56 }
  0xcb   :  { %v286_v51 = vpop.permute.xlu1 %285  ;;  %v105_v33 = vpop.permute.xlu0 %104 }
  0xcc   :  { %v674_v38 = vpack.c.bf16 %v645_v29, %v644_v32  ;;  %v389_v43 = vmul.f32 %v2046_v9, %v286_v51  ;;  %v226_v47 = vmul.f32 %v2048_v12, %v105_v33 }
  0xce   :  { %1698 = vset.pattern.permute.xlu1 %v1752_v7  ;;  %1585 = vmatprep.mubr.bf16.mxu0 %v674_v38  ;;  %v421_v63 = vadd.f32 %v389_v43, %v225_v35 }
  0xcf   :  { %174 = vperm.xlu1 %1698, %v43_v34   ;;  %v115_v45 = vpop.permute.xlu0 %114 }
  0xd0   :  { %v110_v46 = vpop.permute.xlu1 %109  ;;  %v617_v10 = vadd.f32 %v585_v37, %v421_v63  ;;  %v228_v38 = vmul.f32 %v2048_v12, %v115_v45 }
  0xd1   :  { %v227_v22 = vmul.f32 %v2048_v12, %v110_v46 }
  0xd2   :  { %1586 = vmatmul.mubr.bf16.gmra.mrb[4].mxu0 %v675_v48  ;;  %v649_v62 = vmax.f32 %v617_v10, 0.0  ;;  %v588_v48 = vmul.f32 %v2053_v16, %v2025_v55 }
  0xd3   :  { %1699 = vset.pattern.permute.xlu1 %v1751_v2  ;;  %v2099_v49 = vpop.permute.xlu0 %139 }
  0xd4   :  { %345 = vperm.xlu1 %1699, %v43_v34  }
  0xd5   :  { %v294_v54 = vpop.permute.xlu1 %293 }
  0xd6   :  { %v391_v21 = vmul.f32 %v2046_v9, %v294_v54 }
  0xd7   :  { %v2104_v39 = vpop.permute.xlu0 %144 }
  0xd8   :  { %349 = vperm.xlu1 %1699, %v1880_v19   ;;  %v423_v24 = vadd.f32 %v391_v21, %v227_v22 }
  0xda   :  { %v478_v4 = vpop.permute.xlu1 %477 }
  0xdb   :  { %v584_v13 = vmul.f32 %v2053_v16, %v478_v4  ;;  %v2112_v52 = vpop.permute.xlu0 %154 }
  0xdc   :  { %1700 = vset.pattern.permute.xlu1 %v1752_v7 }
  0xdd   :  { %v616_v53 = vadd.f32 %v584_v13, %v420_v5  ;;  %189 = vperm.xlu1 %1700, %v46_v42   ;;  %v1719_v13 = vld [vmem:[%s2281_s3] sm:$0xff]  }
  0xde   :  { %v486_v14 = vpop.permute.xlu1 %485  ;;  %1613 = vmatprep.subr.bf16.mxu1 %v1719_v13 }
  0xdf   :  { %v648_v19 = vmax.f32 %v616_v53, 0.0  ;;  %v2115_v11 = vpop.permute.xlu0 %179  ;;  %v586_v26 = vmul.f32 %v2053_v16, %v486_v14  ;;  %1614 = vmatpush3.bf16.msra.mxu1 %v1719_v13 }
  0xe1   :  { %1701 = vset.pattern.permute.xlu1 %v1751_v2  ;;  %v676_v3 = vpack.c.bf16 %v649_v62, %v648_v19 }
  0xe2   :  { %357 = vperm.xlu1 %1701, %v46_v42   ;;  %v490_v17 = vpop.permute.xlu1 %489 }
  0xe3   :  { %1589 = vmatprep.mubr.bf16.mxu0 %v676_v3  ;;  %v2118_v18 = vpop.permute.xlu0 %184  ;;  %v587_v23 = vmul.f32 %v2053_v16, %v490_v17 }
  0xe5   :  { %v619_v27 = vadd.f32 %v587_v23, %v423_v24  ;;  %v1720_v23 = vld [vmem:[%s2281_s3 + $0x8] sm:$0xff]  }
  0xe6   :  { %1702 = vset.pattern.permute.xlu1 %v1753_v8  ;;  %1615 = vmatprep.subr.bf16.mxu1 %v1720_v23 }
  0xe7   :  { %541 = vperm.xlu1 %1702, %v43_v34   ;;  %v120_v20 = vpop.permute.xlu1 %119  ;;  %v2121_v15 = vpop.permute.xlu0 %194  ;;  %v651_v51 = vmax.f32 %v619_v27, 0.0  ;;  %1616 = vmatpush3.bf16.msra.mxu1 %v1720_v23  ;;  %v1723_v27 = vld [vmem:[%s2281_s3 + $0x20] sm:$0xff]  }
  0xe8   :  { %v229_v45 = vmul.f32 %v2048_v12, %v120_v20 }
  0xeb   :  { %549 = vperm.xlu1 %1702, %v1938_v30  }
  0xec   :  { %v290_v58 = vpop.permute.xlu0 %289  ;;  %v298_v1 = vpop.permute.xlu1 %297 }
  0xed   :  { %v390_v25 = vmul.f32 %v2046_v9, %v290_v58  ;;  %v392_v34 = vmul.f32 %v2046_v9, %v298_v1  ;;  %v233_v1 = vmul.f32 %v2048_v12, %v2099_v49 }
  0xef   :  { %v422_v28 = vadd.f32 %v390_v25, %v226_v47  ;;  %553 = vperm.xlu1 %1702, %v46_v42   ;;  %v424_v35 = vadd.f32 %v392_v34, %v228_v38  ;;  %v593_v25 = vmul.f32 %v2053_v16, %v2031_v59  ;;  %v1725_v59 = vld [vmem:[%s2281_s3 + $0x30] sm:$0xff]   ;;  %v1726_v34 = vld [vmem:[%s2281_s3 + $0x38] sm:$0xff]  }
  0xf0   :  { %v302_v40 = vpop.permute.xlu0 %301 }
  0xf1   :  { %v618_v29 = vadd.f32 %v586_v26, %v422_v28  ;;  %v125_v32 = vpop.permute.xlu1 %124  ;;  %v393_v43 = vmul.f32 %v2046_v9, %v302_v40  ;;  %v620_v63 = vadd.f32 %v588_v48, %v424_v35 }
  0xf2   :  { %v230_v10 = vmul.f32 %v2048_v12, %v125_v32 }
  0xf3   :  { %v650_v33 = vmax.f32 %v618_v29, 0.0  ;;  %1705 = vset.pattern.permute.xlu1 %v1752_v7  ;;  %v425_v55 = vadd.f32 %v393_v43, %v229_v45  ;;  %v652_v53 = vmax.f32 %v620_v63, 0.0 }
  0xf4   :  { %199 = vperm.xlu1 %1705, %v1990_v41   ;;  %v306_v37 = vpop.permute.xlu0 %305 }
  0xf5   :  { %v130_v36 = vpop.permute.xlu1 %129  ;;  %v677_v30 = vpack.c.bf16 %v651_v51, %v650_v33  ;;  %v394_v4 = vmul.f32 %v2046_v9, %v306_v37 }
  0xf6   :  { %v231_v60 = vmul.f32 %v2048_v12, %v130_v36  ;;  %v234_v36 = vmul.f32 %v2048_v12, %v2104_v39 }
  0xf7   :  { %1590 = vmatmul.mubr.bf16.gmra.mrb[8].mxu0 %v677_v30 }
  0xf8   :  { %1706 = vset.pattern.permute.xlu1 %v1751_v2  ;;  %v322_v51 = vpop.permute.xlu0 %321 }
  0xf9   :  { %361 = vperm.xlu1 %1706, %v1944_v31   ;;  %v591_v31 = vmul.f32 %v2053_v16, %v2028_v57  ;;  %v426_v57 = vadd.f32 %v394_v4, %v230_v10  ;;  %v398_v38 = vmul.f32 %v2046_v9, %v322_v51 }
  0xfa   :  { %v310_v46 = vpop.permute.xlu1 %309 }
  0xfb   :  { %v395_v54 = vmul.f32 %v2046_v9, %v310_v46  ;;  %v430_v35 = vadd.f32 %v398_v38, %v234_v36 }
  0xfd   :  { %1707 = vset.pattern.permute.xlu1 %v1752_v7  ;;  %v427_v42 = vadd.f32 %v395_v54, %v231_v60 }
  0xfe   :  { %204 = vperm.xlu1 %1707, %v2001_v44  }
  0xff   :  { %v498_v56 = vpop.permute.xlu1 %497  ;;  %v623_v62 = vadd.f32 %v591_v31, %v427_v42 }
 0x100   :  { %v589_v5 = vmul.f32 %v2053_v16, %v498_v56 }
 0x101   :  { %v655_v21 = vmax.f32 %v623_v62, 0.0  ;;  %v596_v62 = vmul.f32 %v2053_v16, %v2033_v61 }
 0x102   :  { %v621_v7 = vadd.f32 %v589_v5, %v425_v55  ;;  %209 = vperm.xlu1 %1707, %v2016_v50  }
 0x103   :  { %v502_v14 = vpop.permute.xlu1 %501 }
 0x104   :  { %v653_v19 = vmax.f32 %v621_v7, 0.0  ;;  %v590_v3 = vmul.f32 %v2053_v16, %v502_v14  ;;  %v236_v14 = vmul.f32 %v2048_v12, %v2112_v52 }
 0x106   :  { %v622_v17 = vadd.f32 %v590_v3, %v426_v57  ;;  %1708 = vset.pattern.permute.xlu1 %v1751_v2  ;;  %v678_v20 = vpack.c.bf16 %v653_v19, %v652_v53  ;;  %v1721_v2 = vld [vmem:[%s2281_s3 + $0x10] sm:$0xff]  }
 0x107   :  { %373 = vperm.xlu1 %1708, %v2016_v50   ;;  %1617 = vmatprep.subr.bf16.mxu1 %v1721_v2 }
 0x108   :  { %v654_v47 = vmax.f32 %v622_v17, 0.0  ;;  %1593 = vmatprep.mubr.bf16.mxu0 %v678_v20  ;;  %v135_v22 = vpop.permute.xlu1 %134  ;;  %1618 = vmatpush3.bf16.msra.mxu1 %v1721_v2 }
 0x109   :  { %v232_v33 = vmul.f32 %v2048_v12, %v135_v22 }
 0x10a   :  { %v679_v58 = vpack.c.bf16 %v655_v21, %v654_v47  ;;  %v334_v21 = vpop.permute.xlu0 %333 }
 0x10b   :  { %1710 = vset.pattern.permute.xlu1 %v1753_v8  ;;  %v1722_v8 = vld [vmem:[%s2281_s3 + $0x18] sm:$0xff]   ;;  %v401_v22 = vmul.f32 %v2046_v9, %v334_v21 }
 0x10c   :  { %561 = vperm.xlu1 %1710, %v1990_v41   ;;  %1594 = vmatmul.mubr.bf16.gmra.mrb[12].mxu0 %v679_v58 }
 0x10d   :  { %v314_v50 = vpop.permute.xlu1 %313  ;;  %1619 = vmatprep.subr.bf16.mxu1 %v1722_v8 }
 0x10e   :  { %1620 = vmatpush3.bf16.msra.mxu1 %v1722_v8  ;;  %v396_v32 = vmul.f32 %v2046_v9, %v314_v50  ;;  %v338_v2 = vpop.permute.xlu0 %337 }
 0x10f   :  { %1621 = vmatprep.subr.bf16.mxu1 %v1723_v27  ;;  %v402_v50 = vmul.f32 %v2046_v9, %v338_v2 }
 0x110   :  { %565 = vperm.xlu1 %1710, %v2001_v44   ;;  %v1724_v44 = vld [vmem:[%s2281_s3 + $0x28] sm:$0xff]   ;;  %v428_v40 = vadd.f32 %v396_v32, %v232_v33  ;;  %s1754_s3 = smov [#allocation2]  }
 0x111   :  { %v318_v24 = vpop.permute.xlu1 %317  ;;  %s1490_s5 = sshll.u32 %s1754_s3, 4  ;;  %s1491_s5 = int_to_ptr.vmem [resolvable:$true] %s1490_s5 }
 0x112   :  { %v397_v41 = vmul.f32 %v2046_v9, %v318_v24  ;;  %1622 = vmatpush3.bf16.msra.mxu1 %v1723_v27  ;;  %s1727_s6 = scalar_lea.vmem %s1491_s5, 512  ;;  %p1732_p1 = scmp.lt.s32.totalorder %s1491_s5, %s1491_s5 }
 0x113   :  { %1623 = vmatprep.subr.bf16.mxu1 %v1724_v44  ;;  %p1728_p0 = scmp.ne.s32.totalorder %s1491_s5, %s1727_s6  ;;  %p1733_p2 = scmp.lt.s32.totalorder %s1727_s6, %s1727_s6 }
 0x114   :  { %v429_v26 = vadd.f32 %v397_v41, %v233_v1 }
 0x115   :  { %p1734_p3 = por %p1733_p2, %p1732_p1 }
 0x116   :  { %v625_v49 = vadd.f32 %v593_v25, %v429_v26  ;;  %v150_v28 = vpop.permute.xlu1 %149  ;;  %1624 = vmatpush3.bf16.msra.mxu1 %v1724_v44  ;;  %v599_v25 = vmul.f32 %v2053_v16, %v2037_v0  ;;  %v241_v0 = vmul.f32 %v2048_v12, %v2115_v11  ;;  %v242_v11 = vmul.f32 %v2048_v12, %v2118_v18 }
 0x117   :  { %1625 = vmatprep.subr.bf16.mxu1 %v1725_v59  ;;  %v235_v60 = vmul.f32 %v2048_v12, %v150_v28  ;;  %p1735_p4 = pnand %p1734_p3, %p1728_p0 }
 0x118   :  { %v657_v54 = vmax.f32 %v625_v49, 0.0 }
 0x11a   :  { %1626 = vmatpush3.bf16.msra.mxu1 %v1725_v59 }
 0x11b   :  { %v326_v29 = vpop.permute.xlu1 %325  ;;  %1627 = vmatprep.subr.bf16.mxu1 %v1726_v34 }
 0x11c   :  { %v399_v37 = vmul.f32 %v2046_v9, %v326_v29 }
 0x11e   :  { %1628 = vmatpush3.bf16.msra.mxu1 %v1726_v34  ;;  %v431_v56 = vadd.f32 %v399_v37, %v235_v60  ;;  %v354_v60 = vpop.permute.xlu0 %353 }
 0x120   :  { %v510_v30 = vpop.permute.xlu1 %509 }
 0x121   :  { %v592_v46 = vmul.f32 %v2053_v16, %v510_v30 }
 0x123   :  { %v624_v48 = vadd.f32 %v592_v46, %v428_v40 }
 0x124   :  { %v518_v43 = vpop.permute.xlu1 %517 }
 0x125   :  { %v656_v45 = vmax.f32 %v624_v48, 0.0  ;;  %v594_v39 = vmul.f32 %v2053_v16, %v518_v43  ;;  %v601_v48 = vmul.f32 %v2053_v16, %v2043_v6 }
 0x127   :  { %v680_v31 = vpack.c.bf16 %v657_v54, %v656_v45  ;;  %v626_v55 = vadd.f32 %v594_v39, %v430_v35 }
 0x128   :  { %v522_v63 = vpop.permute.xlu1 %521 }
 0x129   :  { %v595_v4 = vmul.f32 %v2053_v16, %v522_v63  ;;  %1597 = vmatprep.mubr.bf16.mxu0 %v680_v31  ;;  %v658_v5 = vmax.f32 %v626_v55, 0.0  ;;  %v406_v55 = vmul.f32 %v2046_v9, %v354_v60 }
 0x12b   :  { %v627_v42 = vadd.f32 %v595_v4, %v431_v56 }
 0x12d   :  { %v659_v10 = vmax.f32 %v627_v42, 0.0  ;;  %v160_v7 = vpop.permute.xlu1 %159 }
 0x12e   :  { %v237_v23 = vmul.f32 %v2048_v12, %v160_v7 }
 0x12f   :  { %v681_v13 = vpack.c.bf16 %v659_v10, %v658_v5 }
 0x130   :  { %v433_v8 = vadd.f32 %v401_v22, %v237_v23  ;;  %v366_v23 = vpop.permute.xlu0 %365 }
 0x131   :  { %1598 = vmatmul.mubr.bf16.gmra.mrb[16].mxu0 %v681_v13  ;;  %v438_v13 = vadd.f32 %v406_v55, %v242_v11 }
 0x132   :  { %v330_v53 = vpop.permute.xlu1 %329 }
 0x133   :  { %v400_v57 = vmul.f32 %v2046_v9, %v330_v53 }
 0x134   :  { %v370_v2 = vpop.permute.xlu0 %369 }
 0x135   :  { %v432_v19 = vadd.f32 %v400_v57, %v236_v14 }
 0x137   :  { %v628_v3 = vadd.f32 %v596_v62, %v432_v19  ;;  %v165_v17 = vpop.permute.xlu1 %164 }
 0x138   :  { %v238_v61 = vmul.f32 %v2048_v12, %v165_v17 }
 0x139   :  { %v660_v27 = vmax.f32 %v628_v3, 0.0 }
 0x13a   :  { %v434_v28 = vadd.f32 %v402_v50, %v238_v61 }
 0x13b   :  { %v170_v20 = vpop.permute.xlu1 %169 }
 0x13c   :  { %v239_v52 = vmul.f32 %v2048_v12, %v170_v20 }
 0x140   :  { %v342_v47 = vpop.permute.xlu1 %341 }
 0x141   :  { %v403_v58 = vmul.f32 %v2046_v9, %v342_v47 }
 0x143   :  { %v435_v24 = vadd.f32 %v403_v58, %v239_v52 }
 0x145   :  { %v530_v1 = vpop.permute.xlu1 %529  ;;  %v631_v44 = vadd.f32 %v599_v25, %v435_v24 }
 0x146   :  { %v597_v41 = vmul.f32 %v2053_v16, %v530_v1  ;;  %v558_v1 = vpop.permute.xlu0 %557 }
 0x147   :  { %v663_v33 = vmax.f32 %v631_v44, 0.0 }
 0x148   :  { %v629_v26 = vadd.f32 %v597_v41, %v433_v8  ;;  %v244_v8 = vmul.f32 %v2048_v12, %v2121_v15  ;;  %v604_v41 = vmul.f32 %v2053_v16, %v558_v1 }
 0x149   :  { %v534_v49 = vpop.permute.xlu1 %533 }
 0x14a   :  { %v661_v29 = vmax.f32 %v629_v26, 0.0  ;;  %v598_v59 = vmul.f32 %v2053_v16, %v534_v49  ;;  %v409_v49 = vmul.f32 %v2046_v9, %v366_v23 }
 0x14c   :  { %v630_v32 = vadd.f32 %v598_v59, %v434_v28  ;;  %v682_v51 = vpack.c.bf16 %v661_v29, %v660_v27  ;;  %v570_v27 = vpop.permute.xlu0 %569 }
 0x14d   :  { %v607_v29 = vmul.f32 %v2053_v16, %v570_v27 }
 0x14e   :  { %v662_v36 = vmax.f32 %v630_v32, 0.0  ;;  %1601 = vmatprep.mubr.bf16.mxu0 %v682_v51  ;;  %v175_v30 = vpop.permute.xlu1 %174 }
 0x14f   :  { %v240_v39 = vmul.f32 %v2048_v12, %v175_v30 }
 0x150   :  { %v683_v38 = vpack.c.bf16 %v663_v33, %v662_v36  ;;  %v410_v36 = vmul.f32 %v2046_v9, %v370_v2 }
 0x152   :  { %1602 = vmatmul.mubr.bf16.gmra.mrb[20].mxu0 %v683_v38 }
 0x153   :  { %v346_v34 = vpop.permute.xlu1 %345 }
 0x154   :  { %v404_v45 = vmul.f32 %v2046_v9, %v346_v34 }
 0x156   :  { %v436_v63 = vadd.f32 %v404_v45, %v240_v39 }
 0x157   :  { %v350_v40 = vpop.permute.xlu1 %349 }
 0x158   :  { %v405_v46 = vmul.f32 %v2046_v9, %v350_v40 }
 0x15a   :  { %v437_v35 = vadd.f32 %v405_v46, %v241_v0 }
 0x15c   :  { %v633_v43 = vadd.f32 %v601_v48, %v437_v35  ;;  %v190_v54 = vpop.permute.xlu1 %189 }
 0x15d   :  { %v243_v53 = vmul.f32 %v2048_v12, %v190_v54 }
 0x15e   :  { %v665_v42 = vmax.f32 %v633_v43, 0.0 }
 0x161   :  { %v358_v37 = vpop.permute.xlu1 %357 }
 0x162   :  { %v407_v5 = vmul.f32 %v2046_v9, %v358_v37 }
 0x164   :  { %v439_v62 = vadd.f32 %v407_v5, %v243_v53 }
 0x166   :  { %v542_v31 = vpop.permute.xlu1 %541 }
 0x167   :  { %v600_v56 = vmul.f32 %v2053_v16, %v542_v31 }
 0x169   :  { %v632_v4 = vadd.f32 %v600_v56, %v436_v63 }
 0x16a   :  { %v550_v6 = vpop.permute.xlu1 %549 }
 0x16b   :  { %v664_v10 = vmax.f32 %v632_v4, 0.0  ;;  %v602_v7 = vmul.f32 %v2053_v16, %v550_v6 }
 0x16d   :  { %v684_v14 = vpack.c.bf16 %v665_v42, %v664_v10  ;;  %v634_v19 = vadd.f32 %v602_v7, %v438_v13 }
 0x16e   :  { %v554_v57 = vpop.permute.xlu1 %553 }
 0x16f   :  { %v603_v3 = vmul.f32 %v2053_v16, %v554_v57  ;;  %1605 = vmatprep.mubr.bf16.mxu0 %v684_v14  ;;  %v666_v17 = vmax.f32 %v634_v19, 0.0 }
 0x171   :  { %v635_v18 = vadd.f32 %v603_v3, %v439_v62 }
 0x173   :  { %v667_v20 = vmax.f32 %v635_v18, 0.0  ;;  %v200_v21 = vpop.permute.xlu1 %199 }
 0x174   :  { %v245_v25 = vmul.f32 %v2048_v12, %v200_v21 }
 0x175   :  { %v685_v47 = vpack.c.bf16 %v667_v20, %v666_v17 }
 0x176   :  { %v441_v32 = vadd.f32 %v409_v49, %v245_v25 }
 0x177   :  { %1606 = vmatmul.mubr.bf16.gmra.mrb[24].mxu0 %v685_v47 }
 0x178   :  { %v362_v22 = vpop.permute.xlu1 %361 }
 0x179   :  { %v408_v50 = vmul.f32 %v2046_v9, %v362_v22 }
 0x17b   :  { %v440_v24 = vadd.f32 %v408_v50, %v244_v8 }
 0x17d   :  { %v205_v58 = vpop.permute.xlu1 %204  ;;  %v636_v44 = vadd.f32 %v604_v41, %v440_v24 }
 0x17e   :  { %v246_v15 = vmul.f32 %v2048_v12, %v205_v58 }
 0x17f   :  { %v668_v38 = vmax.f32 %v636_v44, 0.0 }
 0x180   :  { %v442_v40 = vadd.f32 %v410_v36, %v246_v15 }
 0x181   :  { %v210_v52 = vpop.permute.xlu1 %209 }
 0x182   :  { %v247_v28 = vmul.f32 %v2048_v12, %v210_v52 }
 0x186   :  { %v374_v61 = vpop.permute.xlu1 %373 }
 0x187   :  { %v411_v26 = vmul.f32 %v2046_v9, %v374_v61 }
 0x189   :  { %v443_v51 = vadd.f32 %v411_v26, %v247_v28 }
 0x18b   :  { %v562_v59 = vpop.permute.xlu1 %561  ;;  %v639_v0 = vadd.f32 %v607_v29, %v443_v51 }
 0x18c   :  { %v605_v33 = vmul.f32 %v2053_v16, %v562_v59 }
 0x18d   :  { %v671_v54 = vmax.f32 %v639_v0, 0.0 }
 0x18e   :  { %v637_v30 = vadd.f32 %v605_v33, %v441_v32 }
 0x18f   :  { %v566_v34 = vpop.permute.xlu1 %565 }
 0x190   :  { %v669_v46 = vmax.f32 %v637_v30, 0.0  ;;  %v606_v48 = vmul.f32 %v2053_v16, %v566_v34 }
 0x192   :  { %v638_v35 = vadd.f32 %v606_v48, %v442_v40  ;;  %v686_v43 = vpack.c.bf16 %v669_v46, %v668_v38 }
 0x194   :  { %v670_v37 = vmax.f32 %v638_v35, 0.0  ;;  %1609 = vmatprep.mubr.bf16.mxu0 %v686_v43 }
 0x196   :  { %v687_v45 = vpack.c.bf16 %v671_v54, %v670_v37 }
 0x198   :  { %1610 = vmatmul.mubr.bf16.gmra.mrb[28].mxu0 %v687_v45 }
 0x19d   :  { %v1583_v12 = vpop.f32.mrb[0].mxu0 }
 0x19e   :  { %v786_v39 = vpop.f32.mrb[1].mxu0  ;;  %v915_v31 = vmax.f32 %v1583_v12, 0.0 }
 0x19f   :  { %v1584_v60 = vpop.f32.mrb[2].mxu0  ;;  %v913_v56 = vmax.f32 %v786_v39, 0.0 }
 0x1a0   :  { %v916_v9 = vmax.f32 %v1584_v60, 0.0  ;;  %v789_v63 = vpop.f32.mrb[3].mxu0 }
 0x1a1   :  { %v914_v11 = vmax.f32 %v789_v63, 0.0 }
 0x1a2   :  { %v946_v55 = vpack.c.bf16 %v916_v9, %v915_v31 }
 0x1a3   :  { %v945_v4 = vpack.c.bf16 %v914_v11, %v913_v56 }
 0x1a5   :  { %v1587_v6 = vpop.f32.mrb[4].mxu0  ;;  %1629 = vmatprep.mubr.bf16.mxu1 %v945_v4 }
 0x1a6   :  { %v802_v16 = vpop.f32.mrb[5].mxu0  ;;  %1630 = vmatmul.mubr.bf16.vlgmr.msra.gmra.mrb[0].mxu1 %v946_v55  ;;  %v919_v5 = vmax.f32 %v1587_v6, 0.0 }
 0x1a7   :  { %v1588_v42 = vpop.f32.mrb[6].mxu0  ;;  %v917_v13 = vmax.f32 %v802_v16, 0.0 }
 0x1a8   :  { %v920_v10 = vmax.f32 %v1588_v42, 0.0  ;;  %v805_v7 = vpop.f32.mrb[7].mxu0 }
 0x1a9   :  { %v918_v53 = vmax.f32 %v805_v7, 0.0 }
 0x1aa   :  { %v948_v14 = vpack.c.bf16 %v920_v10, %v919_v5 }
 0x1ab   :  { %v947_v57 = vpack.c.bf16 %v918_v53, %v917_v13 }
 0x1ad   :  { %1633 = vmatprep.mubr.bf16.mxu1 %v947_v57 }
 0x1ae   :  { %1634 = vmatmul.mubr.bf16.gmra.mrb[4].mxu1 %v948_v14 }
 0x1ca   :  { %v1591_v62 = vpop.f32.mrb[8].mxu0 }
 0x1cb   :  { %v818_v19 = vpop.f32.mrb[9].mxu0  ;;  %v923_v18 = vmax.f32 %v1591_v62, 0.0 }
 0x1cc   :  { %v1592_v3 = vpop.f32.mrb[10].mxu0  ;;  %v921_v21 = vmax.f32 %v818_v19, 0.0 }
 0x1cd   :  { %v924_v17 = vmax.f32 %v1592_v3, 0.0  ;;  %v821_v20 = vpop.f32.mrb[11].mxu0 }
 0x1ce   :  { %v922_v47 = vmax.f32 %v821_v20, 0.0 }
 0x1cf   :  { %v950_v22 = vpack.c.bf16 %v924_v17, %v923_v18 }
 0x1d0   :  { %v949_v23 = vpack.c.bf16 %v922_v47, %v921_v21 }
 0x1d2   :  { %1637 = vmatprep.mubr.bf16.mxu1 %v949_v23 }
 0x1d3   :  { %1638 = vmatmul.mubr.bf16.gmra.mrb[8].mxu1 %v950_v22 }
 0x1df   :  { %v1595_v58 = vpop.f32.mrb[12].mxu0 }
 0x1e0   :  { %v834_v2 = vpop.f32.mrb[13].mxu0  ;;  %v927_v50 = vmax.f32 %v1595_v58, 0.0 }
 0x1e1   :  { %v1596_v52 = vpop.f32.mrb[14].mxu0  ;;  %v925_v61 = vmax.f32 %v834_v2, 0.0 }
 0x1e2   :  { %v928_v1 = vmax.f32 %v1596_v52, 0.0  ;;  %v837_v8 = vpop.f32.mrb[15].mxu0 }
 0x1e3   :  { %v926_v24 = vmax.f32 %v837_v8, 0.0 }
 0x1e4   :  { %v952_v41 = vpack.c.bf16 %v928_v1, %v927_v50 }
 0x1e5   :  { %v951_v25 = vpack.c.bf16 %v926_v24, %v925_v61 }
 0x1e7   :  { %1641 = vmatprep.mubr.bf16.mxu1 %v951_v25 }
 0x1e8   :  { %1642 = vmatmul.mubr.bf16.gmra.mrb[12].mxu1 %v952_v41 }
 0x204   :  { %v1599_v26 = vpop.f32.mrb[16].mxu0 }
 0x205   :  { %v850_v27 = vpop.f32.mrb[17].mxu0  ;;  %v931_v28 = vmax.f32 %v1599_v26, 0.0 }
 0x206   :  { %v1600_v49 = vpop.f32.mrb[18].mxu0  ;;  %v929_v59 = vmax.f32 %v850_v27, 0.0 }
 0x207   :  { %v932_v44 = vmax.f32 %v1600_v49, 0.0  ;;  %v853_v29 = vpop.f32.mrb[19].mxu0 }
 0x208   :  { %v930_v32 = vmax.f32 %v853_v29, 0.0 }
 0x209   :  { %v954_v15 = vpack.c.bf16 %v932_v44, %v931_v28 }
 0x20a   :  { %v953_v51 = vpack.c.bf16 %v930_v32, %v929_v59 }
 0x20c   :  { %1645 = vmatprep.mubr.bf16.mxu1 %v953_v51 }
 0x20d   :  { %1646 = vmatmul.mubr.bf16.gmra.mrb[16].mxu1 %v954_v15 }
 0x225   :  { %v1603_v33 = vpop.f32.mrb[20].mxu0 }
 0x226   :  { %v866_v36 = vpop.f32.mrb[21].mxu0  ;;  %v935_v38 = vmax.f32 %v1603_v33, 0.0 }
 0x227   :  { %v1604_v30 = vpop.f32.mrb[22].mxu0  ;;  %v933_v0 = vmax.f32 %v866_v36, 0.0 }
 0x228   :  { %v936_v34 = vmax.f32 %v1604_v30, 0.0  ;;  %v869_v40 = vpop.f32.mrb[23].mxu0 }
 0x229   :  { %v934_v46 = vmax.f32 %v869_v40, 0.0 }
 0x22a   :  { %v956_v48 = vpack.c.bf16 %v936_v34, %v935_v38 }
 0x22b   :  { %v955_v35 = vpack.c.bf16 %v934_v46, %v933_v0 }
 0x22d   :  { %1649 = vmatprep.mubr.bf16.mxu1 %v955_v35 }
 0x22e   :  { %1650 = vmatmul.mubr.bf16.gmra.mrb[20].mxu1 %v956_v48 }
 0x24a   :  { %v1607_v43 = vpop.f32.mrb[24].mxu0 }
 0x24b   :  { %v882_v54 = vpop.f32.mrb[25].mxu0  ;;  %v939_v45 = vmax.f32 %v1607_v43, 0.0 }
 0x24c   :  { %v1608_v37 = vpop.f32.mrb[26].mxu0  ;;  %v937_v60 = vmax.f32 %v882_v54, 0.0 }
 0x24d   :  { %v940_v12 = vmax.f32 %v1608_v37, 0.0  ;;  %v885_v39 = vpop.f32.mrb[27].mxu0 }
 0x24e   :  { %v938_v31 = vmax.f32 %v885_v39, 0.0 }
 0x24f   :  { %v958_v9 = vpack.c.bf16 %v940_v12, %v939_v45 }
 0x250   :  { %v957_v63 = vpack.c.bf16 %v938_v31, %v937_v60 }
 0x252   :  { %1653 = vmatprep.mubr.bf16.mxu1 %v957_v63 }
 0x253   :  { %1654 = vmatmul.mubr.bf16.gmra.mrb[24].mxu1 %v958_v9 }
 0x26b   :  { %v1611_v56 = vpop.f32.mrb[28].mxu0 }
 0x26c   :  { %v898_v11 = vpop.f32.mrb[29].mxu0  ;;  %v943_v4 = vmax.f32 %v1611_v56, 0.0 }
 0x26d   :  { %v1612_v55 = vpop.f32.mrb[30].mxu0  ;;  %v941_v42 = vmax.f32 %v898_v11, 0.0 }
 0x26e   :  { %v944_v6 = vmax.f32 %v1612_v55, 0.0  ;;  %v901_v16 = vpop.f32.mrb[31].mxu0 }
 0x26f   :  { %v942_v5 = vmax.f32 %v901_v16, 0.0 }
 0x270   :  { %v960_v10 = vpack.c.bf16 %v944_v6, %v943_v4 }
 0x271   :  { %v959_v7 = vpack.c.bf16 %v942_v5, %v941_v42 }
 0x273   :  { %1657 = vmatprep.mubr.bf16.mxu1 %v959_v7 }
 0x274   :  { %1658 = vmatmul.mubr.bf16.gmra.mrb[28].mxu1 %v960_v10 }
 0x279   :  { %v1631_v13 = vpop.f32.mrb[0].mxu1 }
 0x27a   :  { %v1188_v53 = vmax.f32 %v1631_v13, 0.0  ;;  %v1059_v14 = vpop.f32.mrb[1].mxu1 }
 0x27b   :  { %v1186_v57 = vmax.f32 %v1059_v14, 0.0  ;;  %v1632_v62 = vpop.f32.mrb[2].mxu1 }
 0x27c   :  { %v1230_v19 = vrot.slane %v1188_v53, 4  ;;  %v1189_v3 = vmax.f32 %v1632_v62, 0.0  ;;  %v1062_v18 = vpop.f32.mrb[3].mxu1 }
 0x27d   :  { %v1218_v17 = vrot.slane %v1186_v57, 4  ;;  %v1187_v20 = vmax.f32 %v1062_v18, 0.0 }
 0x27e   :  { %v1231_v21 = vmax.f32 %v1188_v53, %v1230_v19  ;;  %v1236_v47 = vrot.slane %v1189_v3, 4 }
 0x27f   :  { %v1219_v22 = vmax.f32 %v1186_v57, %v1218_v17  ;;  %v1224_v23 = vrot.slane %v1187_v20, 4 }
 0x280   :  { %v1232_v58 = vrot.slane %v1231_v21, 2  ;;  %v1237_v2 = vmax.f32 %v1189_v3, %v1236_v47 }
 0x281   :  { %v1220_v52 = vrot.slane %v1219_v22, 2  ;;  %v1225_v50 = vmax.f32 %v1187_v20, %v1224_v23  ;;  %v1635_v1 = vpop.f32.mrb[4].mxu1 }
 0x282   :  { %v1233_v8 = vmax.f32 %v1231_v21, %v1232_v58  ;;  %v1238_v61 = vrot.slane %v1237_v2, 2  ;;  %v1192_v24 = vmax.f32 %v1635_v1, 0.0  ;;  %v1075_v41 = vpop.f32.mrb[5].mxu1 }
 0x283   :  { %v1221_v25 = vmax.f32 %v1219_v22, %v1220_v52  ;;  %v1226_v26 = vrot.slane %v1225_v50, 2  ;;  %v1190_v27 = vmax.f32 %v1075_v41, 0.0  ;;  %v1636_v49 = vpop.f32.mrb[6].mxu1 }
 0x284   :  { %v1239_v28 = vmax.f32 %v1237_v2, %v1238_v61  ;;  %v1254_v44 = vrot.slane %v1192_v24, 4  ;;  %v1193_v29 = vmax.f32 %v1636_v49, 0.0  ;;  %v1078_v59 = vpop.f32.mrb[7].mxu1  ;;  %v1234_v36 = vrot.slane %v1233_v8, 1 }
 0x285   :  { %v1222_v32 = vrot.slane %v1221_v25, 1  ;;  %v1227_v15 = vmax.f32 %v1225_v50, %v1226_v26  ;;  %v1242_v51 = vrot.slane %v1190_v27, 4  ;;  %v1191_v33 = vmax.f32 %v1078_v59, 0.0 }
 0x286   :  { %v1255_v30 = vmax.f32 %v1192_v24, %v1254_v44  ;;  %v1260_v38 = vrot.slane %v1193_v29, 4  ;;  %v1240_v34 = vrot.slane %v1239_v28, 1  ;;  %v1235_v12 = vmax.f32 %v1233_v8, %v1234_v36 }
 0x287   :  { %v1228_v40 = vrot.slane %v1227_v15, 1  ;;  %v1243_v0 = vmax.f32 %v1190_v27, %v1242_v51  ;;  %v1248_v46 = vrot.slane %v1191_v33, 4  ;;  %v1223_v43 = vmax.f32 %v1221_v25, %v1222_v32 }
 0x288   :  { %v1256_v48 = vrot.slane %v1255_v30, 2  ;;  %v1261_v35 = vmax.f32 %v1193_v29, %v1260_v38  ;;  %v1241_v31 = vmax.f32 %v1239_v28, %v1240_v34 }
 0x289   :  { %v1229_v54 = vmax.f32 %v1227_v15, %v1228_v40  ;;  %v1244_v37 = vrot.slane %v1243_v0, 2  ;;  %v1249_v45 = vmax.f32 %v1191_v33, %v1248_v46 }
 0x28a   :  { %v1257_v39 = vmax.f32 %v1255_v30, %v1256_v48  ;;  %v1262_v60 = vrot.slane %v1261_v35, 2 }
 0x28b   :  { %v1443_v9 = vsel %vm1442_vm0, %v1229_v54, %v1223_v43  ;;  %v1245_v63 = vmax.f32 %v1243_v0, %v1244_v37  ;;  %v1250_v56 = vrot.slane %v1249_v45, 2 }
 0x28c   :  { %v1445_v11 = vsel %vm1444_vm1, %v1235_v12, %v1443_v9  ;;  %v1263_v55 = vmax.f32 %v1261_v35, %v1262_v60  ;;  %v1258_v42 = vrot.slane %v1257_v39, 1 }
 0x28d   :  { %v1246_v4 = vrot.slane %v1245_v63, 1  ;;  %v1447_v6 = vsel %vm1446_vm2, %v1241_v31, %v1445_v11  ;;  %v1251_v16 = vmax.f32 %v1249_v45, %v1250_v56 }
 0x28e   :  { %v1264_v10 = vrot.slane %v1263_v55, 1  ;;  %v1259_v14 = vmax.f32 %v1257_v39, %v1258_v42 }
 0x28f   :  { %v1247_v5 = vmax.f32 %v1245_v63, %v1246_v4  ;;  %v1252_v7 = vrot.slane %v1251_v16, 1 }
 0x290   :  { %v1265_v57 = vmax.f32 %v1263_v55, %v1264_v10 }
 0x291   :  { %v1449_v13 = vsel %vm1448_vm3, %v1247_v5, %v1447_v6  ;;  %v1253_v53 = vmax.f32 %v1251_v16, %v1252_v7 }
 0x293   :  { %v1451_v62 = vsel %vm1450_vm4, %v1253_v53, %v1449_v13 }
 0x294   :  { %v1453_v19 = vsel %vm1452_vm5, %v1259_v14, %v1451_v62 }
 0x295   :  { %v1455_v3 = vsel %vm1454_vm6, %v1265_v57, %v1453_v19 }
 0x296   :  { %1481 = vst [vmem:[#allocation2] sm:$0xff] %v1455_v3 }
 0x2a6   :  { %v1639_v18 = vpop.f32.mrb[8].mxu1 }
 0x2a7   :  { %v1196_v17 = vmax.f32 %v1639_v18, 0.0  ;;  %v1091_v20 = vpop.f32.mrb[9].mxu1 }
 0x2a8   :  { %v1194_v21 = vmax.f32 %v1091_v20, 0.0  ;;  %v1640_v47 = vpop.f32.mrb[10].mxu1 }
 0x2a9   :  { %v1278_v22 = vrot.slane %v1196_v17, 4  ;;  %v1197_v23 = vmax.f32 %v1640_v47, 0.0  ;;  %v1094_v58 = vpop.f32.mrb[11].mxu1 }
 0x2aa   :  { %v1266_v2 = vrot.slane %v1194_v21, 4  ;;  %v1195_v52 = vmax.f32 %v1094_v58, 0.0 }
 0x2ab   :  { %v1279_v50 = vmax.f32 %v1196_v17, %v1278_v22  ;;  %v1284_v1 = vrot.slane %v1197_v23, 4 }
 0x2ac   :  { %v1267_v8 = vmax.f32 %v1194_v21, %v1266_v2  ;;  %v1272_v61 = vrot.slane %v1195_v52, 4 }
 0x2ad   :  { %v1280_v24 = vrot.slane %v1279_v50, 2  ;;  %v1285_v41 = vmax.f32 %v1197_v23, %v1284_v1 }
 0x2ae   :  { %v1268_v25 = vrot.slane %v1267_v8, 2  ;;  %v1273_v26 = vmax.f32 %v1195_v52, %v1272_v61 }
 0x2af   :  { %v1281_v27 = vmax.f32 %v1279_v50, %v1280_v24  ;;  %v1286_v49 = vrot.slane %v1285_v41, 2 }
 0x2b0   :  { %v1269_v28 = vmax.f32 %v1267_v8, %v1268_v25  ;;  %v1274_v44 = vrot.slane %v1273_v26, 2 }
 0x2b1   :  { %v1287_v29 = vmax.f32 %v1285_v41, %v1286_v49  ;;  %v1282_v15 = vrot.slane %v1281_v27, 1 }
 0x2b2   :  { %v1270_v59 = vrot.slane %v1269_v28, 1  ;;  %v1275_v32 = vmax.f32 %v1273_v26, %v1274_v44 }
 0x2b3   :  { %v1288_v51 = vrot.slane %v1287_v29, 1  ;;  %v1283_v38 = vmax.f32 %v1281_v27, %v1282_v15 }
 0x2b4   :  { %v1276_v33 = vrot.slane %v1275_v32, 1  ;;  %v1271_v36 = vmax.f32 %v1269_v28, %v1270_v59 }
 0x2b5   :  { %v1289_v34 = vmax.f32 %v1287_v29, %v1288_v51 }
 0x2b6   :  { %v1277_v30 = vmax.f32 %v1275_v32, %v1276_v33 }
 0x2b8   :  { %v1456_v40 = vsel %vm1442_vm0, %v1277_v30, %v1271_v36 }
 0x2b9   :  { %v1457_v0 = vsel %vm1444_vm1, %v1283_v38, %v1456_v40 }
 0x2ba   :  { %v1458_v46 = vsel %vm1446_vm2, %v1289_v34, %v1457_v0 }
 0x2bb   :  { %v1643_v48 = vpop.f32.mrb[12].mxu1 }
 0x2bc   :  { %v1200_v35 = vmax.f32 %v1643_v48, 0.0  ;;  %v1107_v43 = vpop.f32.mrb[13].mxu1 }
 0x2bd   :  { %v1198_v54 = vmax.f32 %v1107_v43, 0.0  ;;  %v1644_v37 = vpop.f32.mrb[14].mxu1 }
 0x2be   :  { %v1302_v45 = vrot.slane %v1200_v35, 4  ;;  %v1201_v12 = vmax.f32 %v1644_v37, 0.0  ;;  %v1110_v39 = vpop.f32.mrb[15].mxu1 }
 0x2bf   :  { %v1290_v60 = vrot.slane %v1198_v54, 4  ;;  %v1199_v31 = vmax.f32 %v1110_v39, 0.0 }
 0x2c0   :  { %v1303_v9 = vmax.f32 %v1200_v35, %v1302_v45  ;;  %v1308_v63 = vrot.slane %v1201_v12, 4 }
 0x2c1   :  { %v1291_v56 = vmax.f32 %v1198_v54, %v1290_v60  ;;  %v1296_v11 = vrot.slane %v1199_v31, 4 }
 0x2c2   :  { %v1304_v55 = vrot.slane %v1303_v9, 2  ;;  %v1309_v4 = vmax.f32 %v1201_v12, %v1308_v63 }
 0x2c3   :  { %v1292_v6 = vrot.slane %v1291_v56, 2  ;;  %v1297_v16 = vmax.f32 %v1199_v31, %v1296_v11 }
 0x2c4   :  { %v1305_v42 = vmax.f32 %v1303_v9, %v1304_v55  ;;  %v1310_v5 = vrot.slane %v1309_v4, 2 }
 0x2c5   :  { %v1293_v10 = vmax.f32 %v1291_v56, %v1292_v6  ;;  %v1298_v7 = vrot.slane %v1297_v16, 2 }
 0x2c6   :  { %v1311_v13 = vmax.f32 %v1309_v4, %v1310_v5  ;;  %v1306_v57 = vrot.slane %v1305_v42, 1 }
 0x2c7   :  { %v1294_v53 = vrot.slane %v1293_v10, 1  ;;  %v1299_v14 = vmax.f32 %v1297_v16, %v1298_v7 }
 0x2c8   :  { %v1312_v19 = vrot.slane %v1311_v13, 1  ;;  %v1307_v20 = vmax.f32 %v1305_v42, %v1306_v57 }
 0x2c9   :  { %v1295_v62 = vmax.f32 %v1293_v10, %v1294_v53  ;;  %v1300_v3 = vrot.slane %v1299_v14, 1 }
 0x2ca   :  { %v1313_v21 = vmax.f32 %v1311_v13, %v1312_v19 }
 0x2cb   :  { %v1459_v18 = vsel %vm1448_vm3, %v1295_v62, %v1458_v46  ;;  %v1301_v17 = vmax.f32 %v1299_v14, %v1300_v3 }
 0x2cd   :  { %v1460_v47 = vsel %vm1450_vm4, %v1301_v17, %v1459_v18 }
 0x2ce   :  { %v1461_v22 = vsel %vm1452_vm5, %v1307_v20, %v1460_v47 }
 0x2cf   :  { %v1462_v23 = vsel %vm1454_vm6, %v1313_v21, %v1461_v22 }
 0x2d0   :  { %1482 = vst [vmem:[#allocation2 + $0x8] sm:$0xff] %v1462_v23 }
 0x2e0   :  { %v1647_v58 = vpop.f32.mrb[16].mxu1 }
 0x2e1   :  { %v1204_v2 = vmax.f32 %v1647_v58, 0.0  ;;  %v1123_v52 = vpop.f32.mrb[17].mxu1 }
 0x2e2   :  { %v1202_v50 = vmax.f32 %v1123_v52, 0.0  ;;  %v1648_v1 = vpop.f32.mrb[18].mxu1 }
 0x2e3   :  { %v1326_v8 = vrot.slane %v1204_v2, 4  ;;  %v1205_v61 = vmax.f32 %v1648_v1, 0.0  ;;  %v1126_v24 = vpop.f32.mrb[19].mxu1 }
 0x2e4   :  { %v1314_v41 = vrot.slane %v1202_v50, 4  ;;  %v1203_v25 = vmax.f32 %v1126_v24, 0.0 }
 0x2e5   :  { %v1327_v26 = vmax.f32 %v1204_v2, %v1326_v8  ;;  %v1332_v27 = vrot.slane %v1205_v61, 4 }
 0x2e6   :  { %v1315_v49 = vmax.f32 %v1202_v50, %v1314_v41  ;;  %v1320_v28 = vrot.slane %v1203_v25, 4 }
 0x2e7   :  { %v1328_v44 = vrot.slane %v1327_v26, 2  ;;  %v1333_v29 = vmax.f32 %v1205_v61, %v1332_v27 }
 0x2e8   :  { %v1316_v59 = vrot.slane %v1315_v49, 2  ;;  %v1321_v32 = vmax.f32 %v1203_v25, %v1320_v28 }
 0x2e9   :  { %v1329_v15 = vmax.f32 %v1327_v26, %v1328_v44  ;;  %v1334_v51 = vrot.slane %v1333_v29, 2 }
 0x2ea   :  { %v1317_v33 = vmax.f32 %v1315_v49, %v1316_v59  ;;  %v1322_v36 = vrot.slane %v1321_v32, 2 }
 0x2eb   :  { %v1335_v30 = vmax.f32 %v1333_v29, %v1334_v51  ;;  %v1330_v40 = vrot.slane %v1329_v15, 1 }
 0x2ec   :  { %v1318_v38 = vrot.slane %v1317_v33, 1  ;;  %v1323_v34 = vmax.f32 %v1321_v32, %v1322_v36 }
 0x2ed   :  { %v1336_v0 = vrot.slane %v1335_v30, 1  ;;  %v1331_v43 = vmax.f32 %v1329_v15, %v1330_v40 }
 0x2ee   :  { %v1324_v46 = vrot.slane %v1323_v34, 1  ;;  %v1319_v48 = vmax.f32 %v1317_v33, %v1318_v38 }
 0x2ef   :  { %v1337_v54 = vmax.f32 %v1335_v30, %v1336_v0 }
 0x2f0   :  { %v1325_v35 = vmax.f32 %v1323_v34, %v1324_v46 }
 0x2f2   :  { %v1463_v37 = vsel %vm1442_vm0, %v1325_v35, %v1319_v48 }
 0x2f3   :  { %v1464_v45 = vsel %vm1444_vm1, %v1331_v43, %v1463_v37 }
 0x2f4   :  { %v1465_v12 = vsel %vm1446_vm2, %v1337_v54, %v1464_v45 }
 0x301   :  { %v1651_v39 = vpop.f32.mrb[20].mxu1 }
 0x302   :  { %v1208_v60 = vmax.f32 %v1651_v39, 0.0  ;;  %v1139_v31 = vpop.f32.mrb[21].mxu1 }
 0x303   :  { %v1206_v9 = vmax.f32 %v1139_v31, 0.0  ;;  %v1652_v63 = vpop.f32.mrb[22].mxu1 }
 0x304   :  { %v1350_v56 = vrot.slane %v1208_v60, 4  ;;  %v1209_v11 = vmax.f32 %v1652_v63, 0.0  ;;  %v1142_v55 = vpop.f32.mrb[23].mxu1 }
 0x305   :  { %v1338_v4 = vrot.slane %v1206_v9, 4  ;;  %v1207_v6 = vmax.f32 %v1142_v55, 0.0 }
 0x306   :  { %v1351_v16 = vmax.f32 %v1208_v60, %v1350_v56  ;;  %v1356_v42 = vrot.slane %v1209_v11, 4 }
 0x307   :  { %v1339_v5 = vmax.f32 %v1206_v9, %v1338_v4  ;;  %v1344_v10 = vrot.slane %v1207_v6, 4 }
 0x308   :  { %v1352_v7 = vrot.slane %v1351_v16, 2  ;;  %v1357_v13 = vmax.f32 %v1209_v11, %v1356_v42 }
 0x309   :  { %v1340_v53 = vrot.slane %v1339_v5, 2  ;;  %v1345_v14 = vmax.f32 %v1207_v6, %v1344_v10 }
 0x30a   :  { %v1353_v57 = vmax.f32 %v1351_v16, %v1352_v7  ;;  %v1358_v62 = vrot.slane %v1357_v13, 2 }
 0x30b   :  { %v1341_v19 = vmax.f32 %v1339_v5, %v1340_v53  ;;  %v1346_v3 = vrot.slane %v1345_v14, 2 }
 0x30c   :  { %v1359_v18 = vmax.f32 %v1357_v13, %v1358_v62  ;;  %v1354_v21 = vrot.slane %v1353_v57, 1 }
 0x30d   :  { %v1342_v17 = vrot.slane %v1341_v19, 1  ;;  %v1347_v20 = vmax.f32 %v1345_v14, %v1346_v3 }
 0x30e   :  { %v1360_v22 = vrot.slane %v1359_v18, 1  ;;  %v1355_v52 = vmax.f32 %v1353_v57, %v1354_v21 }
 0x30f   :  { %v1343_v47 = vmax.f32 %v1341_v19, %v1342_v17  ;;  %v1348_v23 = vrot.slane %v1347_v20, 1 }
 0x310   :  { %v1361_v50 = vmax.f32 %v1359_v18, %v1360_v22 }
 0x311   :  { %v1466_v58 = vsel %vm1448_vm3, %v1343_v47, %v1465_v12  ;;  %v1349_v2 = vmax.f32 %v1347_v20, %v1348_v23 }
 0x313   :  { %v1467_v1 = vsel %vm1450_vm4, %v1349_v2, %v1466_v58 }
 0x314   :  { %v1468_v8 = vsel %vm1452_vm5, %v1355_v52, %v1467_v1 }
 0x315   :  { %v1469_v61 = vsel %vm1454_vm6, %v1361_v50, %v1468_v8 }
 0x316   :  { %1483 = vst [vmem:[#allocation2 + $0x10] sm:$0xff] %v1469_v61 }
 0x326   :  { %v1655_v24 = vpop.f32.mrb[24].mxu1 }
 0x327   :  { %v1212_v41 = vmax.f32 %v1655_v24, 0.0  ;;  %v1155_v25 = vpop.f32.mrb[25].mxu1 }
 0x328   :  { %v1210_v26 = vmax.f32 %v1155_v25, 0.0  ;;  %v1656_v27 = vpop.f32.mrb[26].mxu1 }
 0x329   :  { %v1374_v49 = vrot.slane %v1212_v41, 4  ;;  %v1213_v28 = vmax.f32 %v1656_v27, 0.0  ;;  %v1158_v44 = vpop.f32.mrb[27].mxu1 }
 0x32a   :  { %v1362_v29 = vrot.slane %v1210_v26, 4  ;;  %v1211_v59 = vmax.f32 %v1158_v44, 0.0 }
 0x32b   :  { %v1375_v32 = vmax.f32 %v1212_v41, %v1374_v49  ;;  %v1380_v15 = vrot.slane %v1213_v28, 4 }
 0x32c   :  { %v1363_v51 = vmax.f32 %v1210_v26, %v1362_v29  ;;  %v1368_v33 = vrot.slane %v1211_v59, 4 }
 0x32d   :  { %v1376_v36 = vrot.slane %v1375_v32, 2  ;;  %v1381_v30 = vmax.f32 %v1213_v28, %v1380_v15 }
 0x32e   :  { %v1364_v38 = vrot.slane %v1363_v51, 2  ;;  %v1369_v34 = vmax.f32 %v1211_v59, %v1368_v33 }
 0x32f   :  { %v1377_v40 = vmax.f32 %v1375_v32, %v1376_v36  ;;  %v1382_v0 = vrot.slane %v1381_v30, 2 }
 0x330   :  { %v1365_v46 = vmax.f32 %v1363_v51, %v1364_v38  ;;  %v1370_v48 = vrot.slane %v1369_v34, 2 }
 0x331   :  { %v1383_v35 = vmax.f32 %v1381_v30, %v1382_v0  ;;  %v1378_v37 = vrot.slane %v1377_v40, 1 }
 0x332   :  { %v1366_v43 = vrot.slane %v1365_v46, 1  ;;  %v1371_v54 = vmax.f32 %v1369_v34, %v1370_v48 }
 0x333   :  { %v1384_v45 = vrot.slane %v1383_v35, 1  ;;  %v1379_v31 = vmax.f32 %v1377_v40, %v1378_v37 }
 0x334   :  { %v1372_v12 = vrot.slane %v1371_v54, 1  ;;  %v1367_v39 = vmax.f32 %v1365_v46, %v1366_v43 }
 0x335   :  { %v1385_v9 = vmax.f32 %v1383_v35, %v1384_v45 }
 0x336   :  { %v1373_v60 = vmax.f32 %v1371_v54, %v1372_v12 }
 0x338   :  { %v1470_v63 = vsel %vm1442_vm0, %v1373_v60, %v1367_v39 }
 0x339   :  { %v1471_v56 = vsel %vm1444_vm1, %v1379_v31, %v1470_v63 }
 0x33a   :  { %v1472_v11 = vsel %vm1446_vm2, %v1385_v9, %v1471_v56 }
 0x347   :  { %v1659_v55 = vpop.f32.mrb[28].mxu1 }
 0x348   :  { %v1216_v4 = vmax.f32 %v1659_v55, 0.0  ;;  %v1171_v6 = vpop.f32.mrb[29].mxu1 }
 0x349   :  { %v1214_v16 = vmax.f32 %v1171_v6, 0.0  ;;  %v1660_v42 = vpop.f32.mrb[30].mxu1 }
 0x34a   :  { %v1398_v5 = vrot.slane %v1216_v4, 4  ;;  %v1217_v10 = vmax.f32 %v1660_v42, 0.0  ;;  %v1174_v7 = vpop.f32.mrb[31].mxu1 }
 0x34b   :  { %v1386_v13 = vrot.slane %v1214_v16, 4  ;;  %v1215_v53 = vmax.f32 %v1174_v7, 0.0 }
 0x34c   :  { %v1399_v14 = vmax.f32 %v1216_v4, %v1398_v5  ;;  %v1404_v57 = vrot.slane %v1217_v10, 4 }
 0x34d   :  { %v1387_v62 = vmax.f32 %v1214_v16, %v1386_v13  ;;  %v1392_v19 = vrot.slane %v1215_v53, 4 }
 0x34e   :  { %v1400_v3 = vrot.slane %v1399_v14, 2  ;;  %v1405_v18 = vmax.f32 %v1217_v10, %v1404_v57 }
 0x34f   :  { %v1388_v17 = vrot.slane %v1387_v62, 2  ;;  %v1393_v20 = vmax.f32 %v1215_v53, %v1392_v19 }
 0x350   :  { %v1401_v21 = vmax.f32 %v1399_v14, %v1400_v3  ;;  %v1406_v47 = vrot.slane %v1405_v18, 2 }
 0x351   :  { %v1389_v22 = vmax.f32 %v1387_v62, %v1388_v17  ;;  %v1394_v23 = vrot.slane %v1393_v20, 2 }
 0x352   :  { %v1407_v58 = vmax.f32 %v1405_v18, %v1406_v47  ;;  %v1402_v50 = vrot.slane %v1401_v21, 1 }
 0x353   :  { %v1390_v2 = vrot.slane %v1389_v22, 1  ;;  %v1395_v52 = vmax.f32 %v1393_v20, %v1394_v23 }
 0x354   :  { %v1408_v8 = vrot.slane %v1407_v58, 1  ;;  %v1403_v25 = vmax.f32 %v1401_v21, %v1402_v50 }
 0x355   :  { %v1391_v1 = vmax.f32 %v1389_v22, %v1390_v2  ;;  %v1396_v61 = vrot.slane %v1395_v52, 1 }
 0x356   :  { %v1409_v26 = vmax.f32 %v1407_v58, %v1408_v8 }
 0x357   :  { %v1473_v24 = vsel %vm1448_vm3, %v1391_v1, %v1472_v11  ;;  %v1397_v41 = vmax.f32 %v1395_v52, %v1396_v61 }
 0x359   :  { %v1474_v27 = vsel %vm1450_vm4, %v1397_v41, %v1473_v24 }
 0x35a   :  { %v1475_v49 = vsel %vm1452_vm5, %v1403_v25, %v1474_v27 }
 0x35b   :  { %v1476_v28 = vsel %vm1454_vm6, %v1409_v26, %v1475_v49 }
 0x35c   :  { %1484 = vst [vmem:[#allocation2 + $0x18] sm:$0xff] %v1476_v28 }
 0x35d   :  { %1738 = shalt.err (!%p1735_p4)
}
 0x35e   :  { %s1739_s9 = scalar_lea.hbm %s2282_s4, 512 }
 0x35f   :  { %p1740_p5 = scmp.ne.s32.totalorder %s2282_s4, %s1739_s9  ;;  %p1743_p6 = scmp.lt.u32.totalorder %s1739_s9, %s2282_s4 }
 0x361   :  { %p1745_p7 = pnand %p1743_p6, %p1740_p5 }
 0x363   :  { %1748 = shalt.err (!%p1745_p7)
}
 0x364   :  { %s1755_s1 = smov 128   ;;  %s1756_s14 = smov 8  }
 0x365   :  { %1496 = dma.vmem_to_hbm [thread:$0]  %s1491_s5, 512, %s2282_s4, [#allocation3], %s1755_s1, %s1755_s1, %s1756_s14  }
 0x366   :  { %1749 = dma.done.wait [#allocation3], 512  }
 0x367   :  { %1750 = vsyncadd [#allocation3], 4294966784 }
 0x368   :  { %1500 = vsyncpa [#allocation3], 1 }

</bundles_post_ra>
